<compile_context>
chip_gen: v7x
topology: tpu7x:2x2x1
jax: 0.10.0
libtpu: 0.0.40
codegen_flags: <defaults>
</compile_context>

<pallas_src>
from typing import NamedTuple

import jax
import jax.numpy as jnp
from jax.experimental import pallas as pl
from jax.experimental.pallas import tpu as pltpu


def _round_up(n, m):
    return ((n + m - 1) // m) * m


def _cdiv(a, b):
    return (a + b - 1) // b


def _sublane_pack(dtype):
    # Minimum second-minor tile: 8 for 4-byte, 16 for 2-byte, 32 for 1-byte.
    return max(8, 32 // jnp.dtype(dtype).itemsize)


def _vmem_cap_bytes():
    # ~0.8x physical VMEM, leaving headroom for Mosaic internal scratch.
    try:
        return int(pltpu.get_tpu_info().vmem_capacity_bytes) * 4 // 5
    except Exception:
        return (64 * 1024 * 1024) * 4 // 5  # most constrained chip (v7x per-TC)


def _default_batch_tile(vmem_cap):
    # v5e/v6e (128 MiB VMEM): 512 rows amortize per-step overhead best.
    # v7x (64 MiB): keep 256 so weights + activations + accumulator still fit.
    return 512 if vmem_cap >= (96 << 20) * 4 // 5 else 256


class DoubleLayerParams(NamedTuple):
    w_enc: jax.Array  # (d_in_p, dim_p)  compute dtype, pre-transposed + padded
    b_enc: jax.Array  # (1, dim_p)       f32
    w_dec: jax.Array  # (dim_p, d_in_p)  compute dtype, pre-transposed + padded
    b_dec: jax.Array  # (1, d_in_p)      f32


class DoubleLayerConfig(NamedTuple):
    d_in: int
    dim: int
    t_dim: int  # latent-dim chunk (multiple of 128, divides padded dim)


def _double_layer_kernel(x_ref, w_enc_ref, b_enc_ref, w_dec_ref, b_dec_ref,
                         z_ref, r_ref, acc_ref):
    j = pl.program_id(1)

    @pl.when(j == 0)
    def _():
        acc_ref[...] = jnp.zeros_like(acc_ref)

    # Encoder chunk: z[:, chunk] = tanh(x @ W_enc[:, chunk] + b_enc[chunk]),
    # f32 accumulation on the MXU, f32 bias add and tanh.
    z_f32 = jnp.tanh(
        jnp.dot(x_ref[...], w_enc_ref[...], preferred_element_type=jnp.float32)
        + b_enc_ref[...]
    )
    # The decoder consumes exactly the value we return (rounded to the compute
    # dtype first), so the (z, recons) pair stays self-consistent.
    z_c = z_f32.astype(w_dec_ref.dtype)
    z_ref[...] = z_c.astype(z_ref.dtype)

    # Decoder partial sum over dim chunks into the f32 accumulator.
    acc_ref[...] += jnp.dot(z_c, w_dec_ref[...],
                            preferred_element_type=jnp.float32)

    @pl.when(j == pl.num_programs(1) - 1)
    def _():
        r_ref[...] = jnp.tanh(acc_ref[...] + b_dec_ref[...]).astype(r_ref.dtype)


def prepare_params(w_enc, b_enc, w_dec, b_dec, compute_dtype=None):
    """Pad (lane-dense) and cast parameters once, outside the per-call path.

    w_enc: (dim, d_in) = PyTorch enc.weight;  b_enc: (dim,)
    w_dec: (d_in, dim) = PyTorch dec.weight;  b_dec: (d_in,)
    compute_dtype: dtype fed to the MXU (jnp.bfloat16 for full-rate matmuls on
      v6e/v7x). None keeps the parameter dtype (bit-faithful f32 path).
    """
    dim, d_in = w_enc.shape
    assert w_dec.shape == (d_in, dim)
    cdt = jnp.dtype(compute_dtype) if compute_dtype is not None else jnp.dtype(w_enc.dtype)
    cbytes = cdt.itemsize
    d_in_p = _round_up(d_in, 128)

    # Chunk the latent dim so resident weight slabs use at most ~half of the
    # usable VMEM (the rest is for activation tiles + f32 accumulator).
    budget = _vmem_cap_bytes() // 2
    n_chunks = 1
    while True:
        t_dim = _round_up(_cdiv(dim, n_chunks), 128)
        wbuf = 1 if n_chunks == 1 else 2  # grid-invariant => single buffer
        wbytes = wbuf * (2 * d_in_p * t_dim * cbytes + 4 * t_dim) + 4 * d_in_p
        if wbytes <= budget or t_dim == 128:
            break
        n_chunks += 1
    dim_p = n_chunks * t_dim

    params = DoubleLayerParams(
        w_enc=jnp.pad(w_enc.T, ((0, d_in_p - d_in), (0, dim_p - dim))).astype(cdt),
        b_enc=jnp.pad(jnp.reshape(b_enc, (1, dim)).astype(jnp.float32),
                      ((0, 0), (0, dim_p - dim))),
        w_dec=jnp.pad(w_dec.T, ((0, dim_p - dim), (0, d_in_p - d_in))).astype(cdt),
        b_dec=jnp.pad(jnp.reshape(b_dec, (1, d_in)).astype(jnp.float32),
                      ((0, 0), (0, d_in_p - d_in))),
    )
    return params, DoubleLayerConfig(d_in=d_in, dim=dim, t_dim=t_dim)


def pretrain_double_layer_forward(x, params, config, *, tb=None):
    """Fused forward: returns (z, recons_x) with shapes (B, dim), (B, d_in)."""
    B, d_in = x.shape
    assert d_in == config.d_in
    dim = config.dim
    d_in_p, dim_p = params.w_enc.shape
    t_dim = config.t_dim
    assert dim_p % t_dim == 0
    n_chunks = dim_p // t_dim

    cdt = params.w_enc.dtype
    out_dtype = x.dtype
    cbytes = jnp.dtype(cdt).itemsize
    obytes = jnp.dtype(out_dtype).itemsize

    vmem_cap = _vmem_cap_bytes()
    if tb is None:
        tb = _default_batch_tile(vmem_cap)

    # Dtype-aware, waste-minimizing batch tile.
    pack = max(_sublane_pack(cdt), _sublane_pack(out_dtype))
    tb_eff = _round_up(_cdiv(B, _cdiv(B, tb)), pack)
    # Keep >= 2 batch steps so ("parallel", ...) can split across v7x's 2 TCs
    # (near-neutral on single-TC v5e/v6e: per-step overhead ~0.35 us).
    if _cdiv(B, tb_eff) < 2 and tb_eff >= 2 * pack:
        tb_eff = _round_up(_cdiv(tb_eff, 2), pack)

    wbuf = 1 if n_chunks == 1 else 2
    fixed_bytes = wbuf * (2 * d_in_p * t_dim * cbytes + 4 * t_dim) + 4 * d_in_p

    def act_bytes(rows):
        return (2 * rows * d_in_p * cbytes      # x tiles (double-buffered)
                + 2 * rows * t_dim * obytes     # z tiles
                + 2 * rows * d_in_p * obytes    # recons tiles
                + rows * d_in_p * 4)            # f32 decoder accumulator

    while tb_eff > pack and fixed_bytes + act_bytes(tb_eff) > vmem_cap:
        tb_eff = max(pack, _round_up(_cdiv(tb_eff, 2), pack))
    # TODO(synk): if even the smallest batch tile does not fit (enormous d_in),
    # add a K-tiling grid axis over d_in as well (x / W_enc K-chunks).

    n_b = _cdiv(B, tb_eff)
    B_p = n_b * tb_eff

    x_in = x
    if (B_p, d_in_p) != (B, d_in):
        x_in = jnp.pad(x, ((0, B_p - B), (0, d_in_p - d_in)))
    if x_in.dtype != cdt:
        x_in = x_in.astype(cdt)

    est = fixed_bytes + act_bytes(tb_eff)
    vmem_limit = int(min(vmem_cap, max(est + est // 4, 32 << 20)))

    cost = pl.CostEstimate(
        flops=int(4 * B_p * d_in_p * dim_p),            # two matmuls
        transcendentals=int(B_p * (dim_p + d_in_p)),    # two tanh passes
        bytes_accessed=int(cbytes * (B_p * d_in_p + 2 * d_in_p * dim_p)
                           + obytes * (B_p * dim_p + B_p * d_in_p)
                           + 4 * (dim_p + d_in_p)),
    )

    def build(single_buffer_consts):
        def spec(shape, index_map, grid_invariant):
            # Grid-invariant blocks never need a prefetched "next" buffer.
            if grid_invariant and single_buffer_consts:
                return pl.BlockSpec(shape, index_map, pipeline_mode=pl.Buffered(1))
            return pl.BlockSpec(shape, index_map)

        const_w = (n_chunks == 1)  # weights invariant only without dim chunks
        return pl.pallas_call(
            _double_layer_kernel,
            out_shape=(
                jax.ShapeDtypeStruct((B_p, dim_p), out_dtype),
                jax.ShapeDtypeStruct((B_p, d_in_p), out_dtype),
            ),
            grid_spec=pltpu.PrefetchScalarGridSpec(
                num_scalar_prefetch=0,
                grid=(n_b, n_chunks),
                in_specs=[
                    pl.BlockSpec((tb_eff, d_in_p), lambda i, j: (i, 0)),     # x
                    spec((d_in_p, t_dim), lambda i, j: (0, j), const_w),     # W_enc
                    spec((1, t_dim), lambda i, j: (0, j), const_w),          # b_enc
                    spec((t_dim, d_in_p), lambda i, j: (j, 0), const_w),     # W_dec
                    spec((1, d_in_p), lambda i, j: (0, 0), True),            # b_dec
                ],
                out_specs=[
                    pl.BlockSpec((tb_eff, t_dim), lambda i, j: (i, j)),      # z
                    pl.BlockSpec((tb_eff, d_in_p), lambda i, j: (i, 0)),     # recons
                ],
                scratch_shapes=[pltpu.VMEM((tb_eff, d_in_p), jnp.float32)],
            ),
            compiler_params=pltpu.CompilerParams(
                dimension_semantics=("parallel", "arbitrary"),
                vmem_limit_bytes=vmem_limit,
            ),
            cost_estimate=cost,
        )

    args = (x_in, params.w_enc, params.b_enc, params.w_dec, params.b_dec)
    try:
        z_p, r_p = build(single_buffer_consts=True)(*args)
    except Exception:
        # Fallback if this JAX version rejects single-buffer pipeline_mode.
        z_p, r_p = build(single_buffer_consts=False)(*args)

    if (B_p, dim_p, d_in_p) == (B, dim, d_in):
        return z_p, r_p
    return z_p[:B, :dim], r_p[:B, :d_in]


def _init_linear(key, out_features, in_features):
    """Deterministic PyTorch-style Linear init: U(-1/sqrt(in), 1/sqrt(in))."""
    kw, kb = jax.random.split(key)
    bound = 1.0 / jnp.sqrt(jnp.float32(in_features))
    w = jax.random.uniform(kw, (out_features, in_features), jnp.float32,
                           -bound, bound)
    b = jax.random.uniform(kb, (out_features,), jnp.float32, -bound, bound)
    return w, b


if __name__ == "__main__":
    key = jax.random.PRNGKey(0)
    k_x, k_enc, k_dec = jax.random.split(key, 3)

    # Small shapes consistent with the module:
    #   X.shape[0] = d_in (feature dim), self.dim = latent dim, batch = B.
    B, d_in, dim = 16, 32, 8

    x = jax.random.normal(k_x, (B, d_in), jnp.float32)

    # enc: Linear(d_in, dim) -> weight (dim, d_in), bias (dim,)
    w_enc, b_enc = _init_linear(k_enc, dim, d_in)
    # dec: Linear(dim, d_in) -> weight (d_in, dim), bias (d_in,)
    w_dec, b_dec = _init_linear(k_dec, d_in, dim)

    # Pure-JAX reference of the PyTorch forward semantics.
    z_ref = jnp.tanh(x @ w_enc.T + b_enc)
    r_ref = jnp.tanh(z_ref @ w_dec.T + b_dec)

    # Exact-precision path (parameter dtype = f32, matches the PyTorch module).
    params32, cfg32 = prepare_params(w_enc, b_enc, w_dec, b_dec)
    z, recons = pretrain_double_layer_forward(x, params32, cfg32)
    jax.block_until_ready((z, recons))
    assert z.shape == (B, dim) and recons.shape == (B, d_in)
    assert jnp.allclose(z, z_ref, atol=1e-5, rtol=1e-5)
    assert jnp.allclose(recons, r_ref, atol=1e-5, rtol=1e-5)

    # bf16-fed-MXU path (full MXU rate on v6e/v7x); looser tolerance vs f32 ref.
    params_bf, cfg_bf = prepare_params(w_enc, b_enc, w_dec, b_dec,
                                       compute_dtype=jnp.bfloat16)
    z_bf, r_bf = pretrain_double_layer_forward(x, params_bf, cfg_bf)
    jax.block_until_ready((z_bf, r_bf))
    assert z_bf.shape == (B, dim) and r_bf.shape == (B, d_in)
    assert jnp.allclose(z_bf, z_ref, atol=5e-2, rtol=0)
    assert jnp.allclose(r_bf, r_ref, atol=5e-2, rtol=0)

    print("KERNEL_OK")
</pallas_src>

<mosaic_0001>
module attributes {stable_mosaic.version = 11 : i64} {
  func.func @_double_layer_kernel(%arg0: i32, %arg1: i32, %arg2: memref<8x128xf32, #tpu.memory_space<vmem>>, %arg3: memref<128x128xf32, #tpu.memory_space<vmem>>, %arg4: memref<1x128xf32, #tpu.memory_space<vmem>>, %arg5: memref<128x128xf32, #tpu.memory_space<vmem>>, %arg6: memref<1x128xf32, #tpu.memory_space<vmem>>, %arg7: memref<8x128xf32, #tpu.memory_space<vmem>>, %arg8: memref<8x128xf32, #tpu.memory_space<vmem>>, %arg9: memref<8x128xf32, #tpu.memory_space<vmem>>) attributes {dimension_semantics = [#tpu.dimension_semantics<parallel>, #tpu.dimension_semantics<arbitrary>], iteration_bounds = array<i64: 2, 1>, scalar_prefetch = 0 : i64, scratch_operands = 1 : i64, tpu.core_type = #tpu.core_type<tc>, window_params = [{transform_indices = @transform_0, window_bounds = array<i64: 8, 128>}, {pipeline_mode = #tpu.pipeline_mode<synchronous>, transform_indices = @transform_1, window_bounds = array<i64: 128, 128>}, {pipeline_mode = #tpu.pipeline_mode<synchronous>, transform_indices = @transform_2, window_bounds = array<i64: 1, 128>}, {pipeline_mode = #tpu.pipeline_mode<synchronous>, transform_indices = @transform_3, window_bounds = array<i64: 128, 128>}, {pipeline_mode = #tpu.pipeline_mode<synchronous>, transform_indices = @transform_4, window_bounds = array<i64: 1, 128>}, {transform_indices = @transform_5, window_bounds = array<i64: 8, 128>}, {transform_indices = @transform_6, window_bounds = array<i64: 8, 128>}]} {
    %c0_i32 = arith.constant 0 : i32
    %0 = arith.cmpi eq, %arg1, %c0_i32 : i32
    %1 = arith.extui %0 : i1 to i32
    %c0_i32_0 = arith.constant 0 : i32
    %2 = arith.cmpi ne, %1, %c0_i32_0 : i32
    scf.if %2 {
      %cst_17 = arith.constant 0.000000e+00 : f32
      %19 = vector.broadcast %cst_17 : f32 to vector<8x128xf32>
      %c0_18 = arith.constant 0 : index
      %c0_19 = arith.constant 0 : index
      %20 = vector.load %arg9[%c0_18, %c0_19] : memref<8x128xf32, #tpu.memory_space<vmem>>, vector<8x128xf32>
      tpu.vector_store %arg9[%c0_18, %c0_19], %19 {strides = array<i32>} : memref<8x128xf32, #tpu.memory_space<vmem>>, vector<8x128xf32>,
    } else {
    }
    %c0 = arith.constant 0 : index
    %c0_1 = arith.constant 0 : index
    %3 = vector.load %arg2[%c0, %c0_1] : memref<8x128xf32, #tpu.memory_space<vmem>>, vector<8x128xf32>
    %c0_2 = arith.constant 0 : index
    %c0_3 = arith.constant 0 : index
    %4 = vector.load %arg3[%c0_2, %c0_3] : memref<128x128xf32, #tpu.memory_space<vmem>>, vector<128x128xf32>
    %cst = arith.constant dense<0.000000e+00> : vector<8x128xf32>
    %5 = tpu.matmul %3, %4, %cst {dimension_numbers = #tpu.dot_dimension_numbers<[1], [0], [0], [1], [0, 0, 1, 1], [], []>} : vector<8x128xf32>, vector<128x128xf32>, vector<8x128xf32> -> vector<8x128xf32>
    %c0_4 = arith.constant 0 : index
    %c0_5 = arith.constant 0 : index
    %6 = vector.load %arg4[%c0_4, %c0_5] : memref<1x128xf32, #tpu.memory_space<vmem>>, vector<1x128xf32>
    %7 = vector.broadcast %6 : vector<1x128xf32> to vector<8x128xf32>
    %8 = arith.addf %5, %7 : vector<8x128xf32>
    %9 = math.tanh %8 : vector<8x128xf32>
    %c0_6 = arith.constant 0 : index
    %c0_7 = arith.constant 0 : index
    %10 = vector.load %arg7[%c0_6, %c0_7] : memref<8x128xf32, #tpu.memory_space<vmem>>, vector<8x128xf32>
    tpu.vector_store %arg7[%c0_6, %c0_7], %9 {strides = array<i32>} : memref<8x128xf32, #tpu.memory_space<vmem>>, vector<8x128xf32>,
    %c0_8 = arith.constant 0 : index
    %c0_9 = arith.constant 0 : index
    %11 = vector.load %arg9[%c0_8, %c0_9] : memref<8x128xf32, #tpu.memory_space<vmem>>, vector<8x128xf32>
    %c0_10 = arith.constant 0 : index
    %c0_11 = arith.constant 0 : index
    %12 = vector.load %arg5[%c0_10, %c0_11] : memref<128x128xf32, #tpu.memory_space<vmem>>, vector<128x128xf32>
    %cst_12 = arith.constant dense<0.000000e+00> : vector<8x128xf32>
    %13 = tpu.matmul %9, %12, %cst_12 {dimension_numbers = #tpu.dot_dimension_numbers<[1], [0], [0], [1], [0, 0, 1, 1], [], []>} : vector<8x128xf32>, vector<128x128xf32>, vector<8x128xf32> -> vector<8x128xf32>
    %14 = arith.addf %11, %13 : vector<8x128xf32>
    %c0_13 = arith.constant 0 : index
    %c0_14 = arith.constant 0 : index
    %15 = vector.load %arg9[%c0_13, %c0_14] : memref<8x128xf32, #tpu.memory_space<vmem>>, vector<8x128xf32>
    tpu.vector_store %arg9[%c0_13, %c0_14], %14 {strides = array<i32>} : memref<8x128xf32, #tpu.memory_space<vmem>>, vector<8x128xf32>,
    %c0_i32_15 = arith.constant 0 : i32
    %16 = arith.cmpi eq, %arg1, %c0_i32_15 : i32
    %17 = arith.extui %16 : i1 to i32
    %c0_i32_16 = arith.constant 0 : i32
    %18 = arith.cmpi ne, %17, %c0_i32_16 : i32
    scf.if %18 {
      %c0_17 = arith.constant 0 : index
      %c0_18 = arith.constant 0 : index
      %19 = vector.load %arg9[%c0_17, %c0_18] : memref<8x128xf32, #tpu.memory_space<vmem>>, vector<8x128xf32>
      %c0_19 = arith.constant 0 : index
      %c0_20 = arith.constant 0 : index
      %20 = vector.load %arg6[%c0_19, %c0_20] : memref<1x128xf32, #tpu.memory_space<vmem>>, vector<1x128xf32>
      %21 = vector.broadcast %20 : vector<1x128xf32> to vector<8x128xf32>
      %22 = arith.addf %19, %21 : vector<8x128xf32>
      %23 = math.tanh %22 : vector<8x128xf32>
      %c0_21 = arith.constant 0 : index
      %c0_22 = arith.constant 0 : index
      %24 = vector.load %arg8[%c0_21, %c0_22] : memref<8x128xf32, #tpu.memory_space<vmem>>, vector<8x128xf32>
      tpu.vector_store %arg8[%c0_21, %c0_22], %23 {strides = array<i32>} : memref<8x128xf32, #tpu.memory_space<vmem>>, vector<8x128xf32>,
    } else {
    }
    return
  }
  func.func @transform_0(%arg0: i32, %arg1: i32) -> (i32, i32) {
    %c0_i32 = arith.constant 0 : i32
    %c0_i32_0 = arith.constant 0 : i32
    return %arg0, %c0_i32 : i32, i32
  }
  func.func @transform_1(%arg0: i32, %arg1: i32) -> (i32, i32) {
    %c0_i32 = arith.constant 0 : i32
    %c0_i32_0 = arith.constant 0 : i32
    return %c0_i32, %arg1 : i32, i32
  }
  func.func @transform_2(%arg0: i32, %arg1: i32) -> (i32, i32) {
    %c0_i32 = arith.constant 0 : i32
    %c0_i32_0 = arith.constant 0 : i32
    return %c0_i32, %arg1 : i32, i32
  }
  func.func @transform_3(%arg0: i32, %arg1: i32) -> (i32, i32) {
    %c0_i32 = arith.constant 0 : i32
    %c0_i32_0 = arith.constant 0 : i32
    return %arg1, %c0_i32 : i32, i32
  }
  func.func @transform_4(%arg0: i32, %arg1: i32) -> (i32, i32) {
    %c0_i32 = arith.constant 0 : i32
    %c0_i32_0 = arith.constant 0 : i32
    %c0_i32_1 = arith.constant 0 : i32
    return %c0_i32, %c0_i32_0 : i32, i32
  }
  func.func @transform_5(%arg0: i32, %arg1: i32) -> (i32, i32) {
    %c0_i32 = arith.constant 0 : i32
    return %arg0, %arg1 : i32, i32
  }
  func.func @transform_6(%arg0: i32, %arg1: i32) -> (i32, i32) {
    %c0_i32 = arith.constant 0 : i32
    %c0_i32_0 = arith.constant 0 : i32
    return %arg0, %c0_i32 : i32, i32
  }
}

module attributes {stable_mosaic.version = 11 : i64} {
  func.func @_double_layer_kernel(%arg0: i32, %arg1: i32, %arg2: memref<8x128xf32, #tpu.memory_space<vmem>>, %arg3: memref<128x128xf32, #tpu.memory_space<vmem>>, %arg4: memref<1x128xf32, #tpu.memory_space<vmem>>, %arg5: memref<128x128xf32, #tpu.memory_space<vmem>>, %arg6: memref<1x128xf32, #tpu.memory_space<vmem>>, %arg7: memref<8x128xf32, #tpu.memory_space<vmem>>, %arg8: memref<8x128xf32, #tpu.memory_space<vmem>>, %arg9: memref<8x128xf32, #tpu.memory_space<vmem>>) attributes {dimension_semantics = [#tpu.dimension_semantics<parallel>, #tpu.dimension_semantics<arbitrary>], iteration_bounds = array<i64: 2, 1>, scalar_prefetch = 0 : i64, scratch_operands = 1 : i64, tpu.core_type = #tpu.core_type<tc>, window_params = [{transform_indices = @transform_0, window_bounds = array<i64: 8, 128>}, {transform_indices = @transform_1, window_bounds = array<i64: 128, 128>}, {transform_indices = @transform_2, window_bounds = array<i64: 1, 128>}, {transform_indices = @transform_3, window_bounds = array<i64: 128, 128>}, {pipeline_mode = #tpu.pipeline_mode<synchronous>, transform_indices = @transform_4, window_bounds = array<i64: 1, 128>}, {transform_indices = @transform_5, window_bounds = array<i64: 8, 128>}, {transform_indices = @transform_6, window_bounds = array<i64: 8, 128>}]} {
    %c0_i32 = arith.constant 0 : i32
    %0 = arith.cmpi eq, %arg1, %c0_i32 : i32
    %1 = arith.extui %0 : i1 to i32
    %c0_i32_0 = arith.constant 0 : i32
    %2 = arith.cmpi ne, %1, %c0_i32_0 : i32
    scf.if %2 {
      %cst_17 = arith.constant 0.000000e+00 : f32
      %19 = vector.broadcast %cst_17 : f32 to vector<8x128xf32>
      %c0_18 = arith.constant 0 : index
      %c0_19 = arith.constant 0 : index
      %20 = vector.load %arg9[%c0_18, %c0_19] : memref<8x128xf32, #tpu.memory_space<vmem>>, vector<8x128xf32>
      tpu.vector_store %arg9[%c0_18, %c0_19], %19 {strides = array<i32>} : memref<8x128xf32, #tpu.memory_space<vmem>>, vector<8x128xf32>,
    } else {
    }
    %c0 = arith.constant 0 : index
    %c0_1 = arith.constant 0 : index
    %3 = vector.load %arg2[%c0, %c0_1] : memref<8x128xf32, #tpu.memory_space<vmem>>, vector<8x128xf32>
    %c0_2 = arith.constant 0 : index
    %c0_3 = arith.constant 0 : index
    %4 = vector.load %arg3[%c0_2, %c0_3] : memref<128x128xf32, #tpu.memory_space<vmem>>, vector<128x128xf32>
    %cst = arith.constant dense<0.000000e+00> : vector<8x128xf32>
    %5 = tpu.matmul %3, %4, %cst {dimension_numbers = #tpu.dot_dimension_numbers<[1], [0], [0], [1], [0, 0, 1, 1], [], []>} : vector<8x128xf32>, vector<128x128xf32>, vector<8x128xf32> -> vector<8x128xf32>
    %c0_4 = arith.constant 0 : index
    %c0_5 = arith.constant 0 : index
    %6 = vector.load %arg4[%c0_4, %c0_5] : memref<1x128xf32, #tpu.memory_space<vmem>>, vector<1x128xf32>
    %7 = vector.broadcast %6 : vector<1x128xf32> to vector<8x128xf32>
    %8 = arith.addf %5, %7 : vector<8x128xf32>
    %9 = math.tanh %8 : vector<8x128xf32>
    %c0_6 = arith.constant 0 : index
    %c0_7 = arith.constant 0 : index
    %10 = vector.load %arg7[%c0_6, %c0_7] : memref<8x128xf32, #tpu.memory_space<vmem>>, vector<8x128xf32>
    tpu.vector_store %arg7[%c0_6, %c0_7], %9 {strides = array<i32>} : memref<8x128xf32, #tpu.memory_space<vmem>>, vector<8x128xf32>,
    %c0_8 = arith.constant 0 : index
    %c0_9 = arith.constant 0 : index
    %11 = vector.load %arg9[%c0_8, %c0_9] : memref<8x128xf32, #tpu.memory_space<vmem>>, vector<8x128xf32>
    %c0_10 = arith.constant 0 : index
    %c0_11 = arith.constant 0 : index
    %12 = vector.load %arg5[%c0_10, %c0_11] : memref<128x128xf32, #tpu.memory_space<vmem>>, vector<128x128xf32>
    %cst_12 = arith.constant dense<0.000000e+00> : vector<8x128xf32>
    %13 = tpu.matmul %9, %12, %cst_12 {dimension_numbers = #tpu.dot_dimension_numbers<[1], [0], [0], [1], [0, 0, 1, 1], [], []>} : vector<8x128xf32>, vector<128x128xf32>, vector<8x128xf32> -> vector<8x128xf32>
    %14 = arith.addf %11, %13 : vector<8x128xf32>
    %c0_13 = arith.constant 0 : index
    %c0_14 = arith.constant 0 : index
    %15 = vector.load %arg9[%c0_13, %c0_14] : memref<8x128xf32, #tpu.memory_space<vmem>>, vector<8x128xf32>
    tpu.vector_store %arg9[%c0_13, %c0_14], %14 {strides = array<i32>} : memref<8x128xf32, #tpu.memory_space<vmem>>, vector<8x128xf32>,
    %c0_i32_15 = arith.constant 0 : i32
    %16 = arith.cmpi eq, %arg1, %c0_i32_15 : i32
    %17 = arith.extui %16 : i1 to i32
    %c0_i32_16 = arith.constant 0 : i32
    %18 = arith.cmpi ne, %17, %c0_i32_16 : i32
    scf.if %18 {
      %c0_17 = arith.constant 0 : index
      %c0_18 = arith.constant 0 : index
      %19 = vector.load %arg9[%c0_17, %c0_18] : memref<8x128xf32, #tpu.memory_space<vmem>>, vector<8x128xf32>
      %c0_19 = arith.constant 0 : index
      %c0_20 = arith.constant 0 : index
      %20 = vector.load %arg6[%c0_19, %c0_20] : memref<1x128xf32, #tpu.memory_space<vmem>>, vector<1x128xf32>
      %21 = vector.broadcast %20 : vector<1x128xf32> to vector<8x128xf32>
      %22 = arith.addf %19, %21 : vector<8x128xf32>
      %23 = math.tanh %22 : vector<8x128xf32>
      %c0_21 = arith.constant 0 : index
      %c0_22 = arith.constant 0 : index
      %24 = vector.load %arg8[%c0_21, %c0_22] : memref<8x128xf32, #tpu.memory_space<vmem>>, vector<8x128xf32>
      tpu.vector_store %arg8[%c0_21, %c0_22], %23 {strides = array<i32>} : memref<8x128xf32, #tpu.memory_space<vmem>>, vector<8x128xf32>,
    } else {
    }
    return
  }
  func.func @transform_0(%arg0: i32, %arg1: i32) -> (i32, i32) {
    %c0_i32 = arith.constant 0 : i32
    %c0_i32_0 = arith.constant 0 : i32
    return %arg0, %c0_i32 : i32, i32
  }
  func.func @transform_1(%arg0: i32, %arg1: i32) -> (i32, i32) {
    %c0_i32 = arith.constant 0 : i32
    %c0_i32_0 = arith.constant 0 : i32
    return %c0_i32, %arg1 : i32, i32
  }
  func.func @transform_2(%arg0: i32, %arg1: i32) -> (i32, i32) {
    %c0_i32 = arith.constant 0 : i32
    %c0_i32_0 = arith.constant 0 : i32
    return %c0_i32, %arg1 : i32, i32
  }
  func.func @transform_3(%arg0: i32, %arg1: i32) -> (i32, i32) {
    %c0_i32 = arith.constant 0 : i32
    %c0_i32_0 = arith.constant 0 : i32
    return %arg1, %c0_i32 : i32, i32
  }
  func.func @transform_4(%arg0: i32, %arg1: i32) -> (i32, i32) {
    %c0_i32 = arith.constant 0 : i32
    %c0_i32_0 = arith.constant 0 : i32
    %c0_i32_1 = arith.constant 0 : i32
    return %c0_i32, %c0_i32_0 : i32, i32
  }
  func.func @transform_5(%arg0: i32, %arg1: i32) -> (i32, i32) {
    %c0_i32 = arith.constant 0 : i32
    return %arg0, %arg1 : i32, i32
  }
  func.func @transform_6(%arg0: i32, %arg1: i32) -> (i32, i32) {
    %c0_i32 = arith.constant 0 : i32
    %c0_i32_0 = arith.constant 0 : i32
    return %arg0, %c0_i32 : i32, i32
  }
}

</mosaic_0001>

<bundles_post_ra>
// kernel: tpu_custom_call.1
= control target key start
LH: loop header
LB: loop body
LE: loop exit
PB: predicated region body
PF: predicated region fallthrough
CT: control target
= control target key end

     0   :  { %12 = vsyncpa [#allocation4], 0  ;;  %s1563_s0 = inlined_call_operand.hbm [shape: f32[16,128], index: 0, kind: input, shape index: {}]   ;;  %s1564_s1 = inlined_call_operand.hbm [shape: f32[128,128], index: 1, kind: input, shape index: {}]   ;;  %s1565_s2 = inlined_call_operand.vmem [shape: f32[1,128], index: 2, kind: input, shape index: {}]   ;;  %s1566_s3 = inlined_call_operand.hbm [shape: f32[128,128], index: 3, kind: input, shape index: {}]   ;;  %s1567_s4 = inlined_call_operand.vmem [shape: f32[1,128], index: 4, kind: input, shape index: {}]   ;;  %s1568_s5 = inlined_call_operand.hbm [shape: f32[16,128], index: 5, kind: output, shape index: {0}]   ;;  %s1569_s6 = inlined_call_operand.hbm [shape: f32[16,128], index: 6, kind: output, shape index: {1}]  }
   0x1   :  { %14 = vsyncpa [#allocation4 + $0x1], 0 }
   0x2   :  { %15 = vsyncpa [#allocation7], 0 }
   0x3   :  { %16 = vsyncpa [#allocation5], 0 }
   0x4   :  { %18 = vsyncpa [#allocation5 + $0x1], 0 }
   0x5   :  { %19 = vsyncpa [#allocation11], 0 }
   0x6   :  { %21 = vsyncpa [#allocation11 + $0x1], 0  ;;  %s1257_s21 = smov 0   ;;  %s1259_s22 = smov 0  }
   0x7   :  { %s1261_s23 = smov 0   ;;  %s1263_s24 = smov 0  }
   0x8   :  { %s1265_s25 = smov 0   ;;  %s1267_s26 = smov 0  }
   0x9 LB: > { %s734_s27 = sadd.s32 4294967295, %s1210_s26   ;;  %s735_s28 = sadd.s32 4294967294, %s1210_s26   ;;  %s1210_s26 = sphi %s1267_s26, %s27_s26   ;;  %s1206_s25 = sphi %s1265_s25, %s1594_s25   ;;  %s1202_s24 = sphi %s1263_s24, %s1593_s24   ;;  %s1198_s23 = sphi %s1261_s23, %s1592_s23   ;;  %s1194_s22 = sphi %s1259_s22, %s1591_s22   ;;  %s1190_s21 = sphi %s1257_s21, %s1590_s21  }
   0xa   : > { %p59_p0 = scmp.ne.s32.totalorder %s1194_s22, %s1190_s21  ;;  %p1291_p1 = scmp.eq.s32.totalorder %s734_s27, 0 }
   0xb   : > { %p1295_p2 = scmp.eq.s32.totalorder %s734_s27, 1  ;;  %p190_p3 = scmp.eq.s32.totalorder %s735_s28, 1 }
   0xc   : > { %s1575_s29 = scalar_select %p1291_p1, 1, 0 }
   0xd   : > { %p1301_p4 = por %p1291_p1, %p59_p0  ;;  %p736_p5 = scmp.ge.s32.totalorder %s1210_s26, 1 }
   0xe   : > { %p1306_p6 = por %p190_p3, %p59_p0  ;;  %p223_p7 = scmp.lt.s32.totalorder %s1210_s26, 3 }
   0xf   : > { %s1577_s7 = scalar_select %p1301_p4, 1, 0 }
  0x10   : > { %s1578_s8 = scalar_select %p1306_p6, 1, 0 }
  0x11   : > { %p1311_p8 = pnand %p736_p5, %p223_p7  ;;  %s1212_s10 = smov [#allocation6]  }
  0x12   : > { %1579 = sst [smem:[#allocation16_spill]] %s1578_s8  ;;  %s237_s11 = sshll.u32 %s1212_s10, 4  ;;  %s1315_s11 = int_to_ptr.vmem [resolvable:$true] %s237_s11 }
  0x13   : > { %p923_p9 = pneg %p1311_p8  ;;  %s1213_s13 = smov [#allocation8]  }
  0x14   : > { %s259_s14 = sshll.u32 %s1213_s13, 4  ;;  %s1006_s17 = scalar_lea.hbm %s1564_s1, 2048  ;;  %s1326_s14 = int_to_ptr.vmem [resolvable:$true] %s259_s14 }
  0x15   : > { %p1322_p11 = pnand %p923_p9, %p1291_p1  ;;  %p1007_p12 = scmp.ne.s32.totalorder %s1564_s1, %s1006_s17 }
  0x16   : > { %p1013_p5 = scmp.lt.u32.totalorder %s1006_s17, %s1564_s1 }
  0x17   : > { %p1008_p13 = pneg %p1322_p11 }
  0x19   : > { %p1009_p0 = pnand %p1008_p13, %p1007_p12 }
  0x1b   : > { %p1010_p3 = pneg %p1009_p0 }
  0x1d   : > { %p1015_p7 = pnand %p1013_p5, %p1010_p3 }
  0x1f   : > { %1018 = shalt.err (!%p1015_p7)
}
  0x20   : > { %s1019_s28 = scalar_lea.vmem %s1315_s11, 2048  ;;  %p1027_p1 = scmp.lt.s32.totalorder %s1315_s11, %s1315_s11 }
  0x21   : > { %p1020_p9 = scmp.ne.s32.totalorder %s1315_s11, %s1019_s28  ;;  %p1028_p12 = scmp.lt.s32.totalorder %s1019_s28, %s1019_s28 }
  0x23   : > { %p1022_p10 = pnand %p1020_p9, %p1008_p13  ;;  %p1029_p0 = por %p1028_p12, %p1027_p1 }
  0x25   : > { %p1023_p6 = pneg %p1022_p10 }
  0x27   : > { %p1030_p4 = pnand %p1029_p0, %p1023_p6 }
  0x29   : > { %1033 = shalt.err (!%p1030_p4)
}
  0x2a   : > { %s1214_s10 = smov 128   ;;  %s1215_s13 = smov 8  }
  0x2b   : > { %926 = dma.hbm_to_vmem [thread:$0]  (!%p1322_p11), %s1564_s1, 2048, %s1315_s11, [#allocation7], %s1214_s10, %s1214_s10, %s1215_s13  }
  0x2c   : > { %s1034_s19 = scalar_lea.hbm %s1566_s3, 2048 }
  0x2d   : > { %p1035_p1 = scmp.ne.s32.totalorder %s1566_s3, %s1034_s19  ;;  %p1041_p10 = scmp.lt.u32.totalorder %s1034_s19, %s1566_s3 }
  0x2f   : > { %p1037_p4 = pnand %p1035_p1, %p1008_p13 }
  0x31   : > { %p1038_p6 = pneg %p1037_p4 }
  0x33   : > { %p1043_p3 = pnand %p1041_p10, %p1038_p6 }
  0x35   : > { %1046 = shalt.err (!%p1043_p3)
}
  0x36   : > { %s1047_s11 = scalar_lea.vmem %s1326_s14, 2048  ;;  %p1055_p12 = scmp.lt.s32.totalorder %s1326_s14, %s1326_s14 }
  0x37   : > { %p1048_p5 = scmp.ne.s32.totalorder %s1326_s14, %s1047_s11  ;;  %p1056_p0 = scmp.lt.s32.totalorder %s1047_s11, %s1047_s11 }
  0x39   : > { %p1050_p7 = pnand %p1048_p5, %p1008_p13  ;;  %p1057_p1 = por %p1056_p0, %p1055_p12 }
  0x3b   : > { %p1051_p9 = pneg %p1050_p7 }
  0x3d   : > { %p1058_p4 = pnand %p1057_p1, %p1051_p9 }
  0x3f   : > { %1061 = shalt.err (!%p1058_p4)
}
  0x40   : > { %929 = dma.hbm_to_vmem [thread:$0]  (!%p1322_p11), %s1566_s3, 2048, %s1326_s14, [#allocation7], %s1214_s10, %s1214_s10, %s1215_s13  }
  0x41   : > { %s39_s16 = sadd.s32 1, %s1206_s25  ;;  %s46_s17 = sadd.s32 1, %s1198_s23 }
  0x42   : > { %p41_p13 = scmp.ge.s32.totalorder %s39_s16, 2  ;;  %p53_p6 = scmp.ne.s32.totalorder %s1198_s23, %s1194_s22 }
  0x43   : > { %p54_p10 = scmp.eq.s32.totalorder %s1210_s26, 0  ;;  %p943_p3 = scmp.lt.s32.totalorder %s1210_s26, 2 }
  0x44   : > { %s1596_s16 = smov (%p41_p13, %s39_s16), 0  ;;  %p1390_p7 = por %p1295_p2, %p53_p6 }
  0x45   : > { %p55_p5 = por %p54_p10, %p53_p6  ;;  %s43_s18 = ssub.s32 %s1206_s25, %s1596_s16 }
  0x46   : > { %s1582_s12 = scalar_select %p1390_p7, 1, 0 }
  0x47   : > { %s276_s19 = sand.u32 1, %s1198_s23   ;;  %p44_p9 = scmp.eq.s32.totalorder %s43_s18, 0 }
  0x48   : > { %s741_s14 = sshll.u32 %s276_s19, 3  ;;  %s742_s10 = sshll.u32 %s1206_s25, 7 }
  0x49   : > { %s1399_s13 = scalar_select %p44_p9, %s1198_s23, %s46_s17  }
  0x4a   : > { %s1404_s28 = scalar_lea.hbm %s1563_s0, %s742_s10  ;;  %s280_s30 = scalar_lea.vmem [#allocation3], %s741_s14 }
  0x4b   : > { %s287_s11 = sshll.u32 %s280_s30, 4  ;;  %p1408_p2 = pnand %p943_p3, %p55_p5  ;;  %s1412_s11 = int_to_ptr.vmem [resolvable:$true] %s287_s11 }
  0x4c   : > { %s277_s15 = scalar_lea.sflag [#allocation4], %s276_s19  ;;  %s1062_s17 = scalar_lea.hbm %s1404_s28, 128 }
  0x4d   : > { %p1063_p11 = scmp.ne.s32.totalorder %s1404_s28, %s1062_s17  ;;  %p1064_p12 = pneg %p1408_p2 }
  0x4e   : > { %s1067_s10 = scalar_lea.hbm %s1563_s0, 256  ;;  %p1068_p4 = scmp.lt.u32.totalorder %s1404_s28, %s1563_s0 }
  0x4f   : > { %p1065_p0 = pnand %p1064_p12, %p1063_p11  ;;  %p1069_p13 = scmp.lt.u32.totalorder %s1067_s10, %s1062_s17 }
  0x50   : > { %p1071_p10 = scmp.lt.u32.totalorder %s1062_s17, %s1404_s28 }
  0x51   : > { %p1066_p1 = pneg %p1065_p0  ;;  %p1070_p6 = por %p1069_p13, %p1068_p4 }
  0x53   : > { %p1072_p3 = por %p1071_p10, %p1070_p6 }
  0x55   : > { %p1073_p5 = pnand %p1072_p3, %p1066_p1 }
  0x57   : > { %1076 = shalt.err (!%p1073_p5)
}
  0x58   : > { %s1077_s19 = scalar_lea.vmem %s1412_s11, 128  ;;  %s1216_s30 = smov [#allocation3]  }
  0x59   : > { %p1078_p9 = scmp.ne.s32.totalorder %s1412_s11, %s1077_s19  ;;  %s1082_s18 = sshll.u32 %s1216_s30, 4  ;;  %s1083_s18 = int_to_ptr.vmem [resolvable:$false] %s1082_s18 }
  0x5a   : > { %s1084_s14 = scalar_lea.vmem %s1083_s18, 256  ;;  %p1085_p7 = scmp.lt.s32.totalorder %s1412_s11, %s1083_s18 }
  0x5b   : > { %p1080_p11 = pnand %p1078_p9, %p1064_p12  ;;  %p1086_p4 = scmp.lt.s32.totalorder %s1084_s14, %s1077_s19 }
  0x5d   : > { %p1081_p0 = pneg %p1080_p11  ;;  %p1087_p13 = por %p1086_p4, %p1085_p7 }
  0x5f   : > { %p1088_p6 = pnand %p1087_p13, %p1081_p0 }
  0x61   : > { %1091 = shalt.err (!%p1088_p6)
}
  0x62   : > { %933 = dma.hbm_to_vmem [thread:$0]  (!%p1408_p2), %s1404_s28, 128, %s1412_s11, %s277_s15  }
  0x63   : > { %296 = sbr.rel (%p1311_p8) target bundleno = 609 (0x261), region = 40  ;;  %s1442_s17 = sand.u32 (!%p1311_p8), 1, %s1194_s22  }
  0x64   : > { %s1445_s10 = sshll.u32 (!%p1311_p8), %s1442_s17, 3  ;;  %s299_s20 = scalar_lea.sflag (!%p1311_p8), [#allocation4], %s1442_s17 }
  0x65   : > { %s302_s27 = scalar_lea.vmem (!%p1311_p8), [#allocation3], %s1445_s10  ;;  %p1584_p7 = scmp.ne.s32.totalorder (!%p1311_p8), %s1577_s7, 0 }
  0x6a   : > { %1173 = dma.done.wait (%p1584_p7), %s299_s20, 128  }
  0x6b   : > { %1175 = vsyncadd (%p1584_p7), %s299_s20, 4294967168  ;;  %p1585_p2 = scmp.ne.s32.totalorder %s1575_s29, 0 }
  0x6d   : > { %1177 = dma.done.wait (%p1585_p2), [#allocation7], 4096  }
  0x6e   : > { %1179 = vsyncadd (%p1585_p2), [#allocation7], 4294963200  ;;  %v1217_v0 = vmov 0.0|0.0   ;;  %vm1218_vm0 = vmmov 0   ;;  %v1219_v1 = vmov 0.0   ;;  %v357_v2 = vld [vmem:[#allocation6] sm:$0xff] }
  0x6f   : > { %861 = vmatprep.subr.bf16.mxu0 %v1217_v0  ;;  %823 = vmatprep.mubr.msk.f32.mxu0 %vm1218_vm0, %v1219_v1  ;;  %v358_v3 = vld [vmem:[#allocation6 + $0x8] sm:$0xff]  ;;  %v359_v4 = vld [vmem:[#allocation6 + $0x10] sm:$0xff]  ;;  %v360_v6 = vld [vmem:[#allocation6 + $0x18] sm:$0xff]  ;;  %s339_s9 = scalar_lea.vmem [#allocation9], %s1445_s10  ;;  %s753_s28 = sshll.u32 %s1202_s24, 7 }
  0x70   : > { %885 = vmatprep.subr.bf16.mxu1 %v1217_v0  ;;  %858 = vmatprep.mubr.msk.f32.mxu1 %vm1218_vm0, %v1219_v1  ;;  %v862_v5 = vpack.c.bf16 %v358_v3, %v357_v2  ;;  %v865_v7 = vpack.c.bf16 %v360_v6, %v359_v4  ;;  %v361_v8 = vld [vmem:[#allocation6 + $0x20] sm:$0xff]  ;;  %v362_v9 = vld [vmem:[#allocation6 + $0x28] sm:$0xff]  ;;  %v455_v12 = vld [vmem:[#allocation8 + $0x10] sm:$0xff]  ;;  %s1485_s15 = scalar_lea.hbm %s1568_s5, %s753_s28  ;;  %s575_s19 = sshll.u32 %s339_s9, 4  ;;  %s576_s19 = int_to_ptr.vmem [resolvable:$true] %s575_s19 }
  0x71   : > { %v453_v10 = vld [vmem:[#allocation8] sm:$0xff]  ;;  %v454_v11 = vld [vmem:[#allocation8 + $0x8] sm:$0xff]  ;;  %v456_v13 = vld [vmem:[#allocation8 + $0x18] sm:$0xff]  ;;  %v868_v14 = vpack.c.bf16 %v362_v9, %v361_v8  ;;  %s556_s30 = scalar_lea.sflag [#allocation5], %s1442_s17  ;;  %s1092_s18 = scalar_lea.vmem %s576_s19, 128 }
  0x72   : > { %863 = vmatpush3.bf16.msra.mxu0 %v862_v5  ;;  %v886_v15 = vpack.c.bf16 %v454_v11, %v453_v10  ;;  %v363_v16 = vld [vmem:[#allocation6 + $0x30] sm:$0xff]  ;;  %v364_v17 = vld [vmem:[#allocation6 + $0x38] sm:$0xff]  ;;  %v889_v18 = vpack.c.bf16 %v456_v13, %v455_v12  ;;  %v457_v19 = vld [vmem:[#allocation8 + $0x20] sm:$0xff]  ;;  %p1093_p8 = scmp.ne.s32.totalorder %s576_s19, %s1092_s18  ;;  %p1586_p12 = scmp.ne.s32.totalorder %s1582_s12, 0 }
  0x73   : > { %864 = vmatprep.subr.bf16.mxu0 %v1217_v0  ;;  %v458_v20 = vld [vmem:[#allocation8 + $0x28] sm:$0xff]  ;;  %v871_v21 = vpack.c.bf16 %v364_v17, %v363_v16  ;;  %v365_v22 = vld [vmem:[#allocation6 + $0x40] sm:$0xff]  ;;  %v459_v25 = vld [vmem:[#allocation8 + $0x30] sm:$0xff]  ;;  %s1220_s14 = smov [#allocation9]  }
  0x74   : > { %887 = vmatpush3.bf16.msra.mxu1 %v886_v15  ;;  %v366_v23 = vld [vmem:[#allocation6 + $0x48] sm:$0xff]  ;;  %v892_v24 = vpack.c.bf16 %v458_v20, %v457_v19  ;;  %v460_v26 = vld [vmem:[#allocation8 + $0x38] sm:$0xff]  ;;  %v367_v28 = vld [vmem:[#allocation6 + $0x50] sm:$0xff]  ;;  %p1094_p1 = pnand %p1093_p8, %p1586_p12  ;;  %s1096_s20 = sshll.u32 %s1220_s14, 4  ;;  %s1097_s20 = int_to_ptr.vmem [resolvable:$false] %s1096_s20 }
  0x75   : > { %888 = vmatprep.subr.bf16.mxu1 %v1217_v0  ;;  %v874_v27 = vpack.c.bf16 %v366_v23, %v365_v22  ;;  %v368_v29 = vld [vmem:[#allocation6 + $0x58] sm:$0xff]  ;;  %v895_v30 = vpack.c.bf16 %v460_v26, %v459_v25  ;;  %v461_v31 = vld [vmem:[#allocation8 + $0x40] sm:$0xff]  ;;  %v462_v32 = vld [vmem:[#allocation8 + $0x48] sm:$0xff]  ;;  %p1099_p3 = scmp.lt.s32.totalorder %s576_s19, %s1097_s20 }
  0x76   : > { %866 = vmatpush3.bf16.msra.mxu0 %v865_v7  ;;  %v877_v33 = vpack.c.bf16 %v368_v29, %v367_v28  ;;  %v369_v34 = vld [vmem:[#allocation6 + $0x60] sm:$0xff]  ;;  %v370_v35 = vld [vmem:[#allocation6 + $0x68] sm:$0xff]  ;;  %v898_v36 = vpack.c.bf16 %v462_v32, %v461_v31  ;;  %v371_v38 = vld [vmem:[#allocation6 + $0x70] sm:$0xff]  ;;  %p1095_p10 = pneg %p1094_p1 }
  0x77   : > { %867 = vmatprep.subr.bf16.mxu0 %v1217_v0  ;;  %v880_v37 = vpack.c.bf16 %v370_v35, %v369_v34  ;;  %v372_v39 = vld [vmem:[#allocation6 + $0x78] sm:$0xff]  ;;  %v463_v42 = vld [vmem:[#allocation8 + $0x50] sm:$0xff]  ;;  %v465_v45 = vld [vmem:[#allocation8 + $0x60] sm:$0xff] }
  0x78   : > { %890 = vmatpush3.bf16.msra.mxu1 %v889_v18  ;;  %v883_v40 = vpack.c.bf16 %v372_v39, %v371_v38  ;;  %v356_v41 = vld [vmem:[%s302_s27] sm:$0xff]  ;;  %v466_v46 = vld [vmem:[#allocation8 + $0x68] sm:$0xff]  ;;  %s1098_s27 = scalar_lea.vmem %s1097_s20, 256 }
  0x79   : > { %891 = vmatprep.subr.bf16.mxu1 %v1217_v0  ;;  %v464_v43 = vld [vmem:[#allocation8 + $0x58] sm:$0xff]  ;;  %v904_v47 = vpack.c.bf16 %v466_v46, %v465_v45  ;;  %v467_v48 = vld [vmem:[#allocation8 + $0x70] sm:$0xff]  ;;  %p1100_p5 = scmp.lt.s32.totalorder %s1098_s27, %s1092_s18 }
  0x7a   : > { %869 = vmatpush3.bf16.msra.mxu0 %v868_v14  ;;  %v901_v44 = vpack.c.bf16 %v464_v43, %v463_v42  ;;  %v468_v49 = vld [vmem:[#allocation8 + $0x78] sm:$0xff]  ;;  %v749_v51 = vld [vmem:[%s1565_s2] ss:$0 sm:$0xff] }
  0x7b   : > { %870 = vmatprep.subr.bf16.mxu0 %v1217_v0  ;;  %v907_v50 = vpack.c.bf16 %v468_v49, %v467_v48  ;;  %p1101_p9 = por %p1100_p5, %p1099_p3 }
  0x7c   : > { %893 = vmatpush3.bf16.msra.mxu1 %v892_v24 }
  0x7d   : > { %894 = vmatprep.subr.bf16.mxu1 %v1217_v0  ;;  %p1102_p11 = pnand %p1101_p9, %p1095_p10 }
  0x7e   : > { %872 = vmatpush3.bf16.msra.mxu0 %v871_v21 }
  0x7f   : > { %873 = vmatprep.subr.bf16.mxu0 %v1217_v0 }
  0x80   : > { %896 = vmatpush3.bf16.msra.mxu1 %v895_v30 }
  0x81   : > { %897 = vmatprep.subr.bf16.mxu1 %v1217_v0 }
  0x82   : > { %875 = vmatpush3.bf16.msra.mxu0 %v874_v27 }
  0x83   : > { %876 = vmatprep.subr.bf16.mxu0 %v1217_v0 }
  0x84   : > { %899 = vmatpush3.bf16.msra.mxu1 %v898_v36 }
  0x85   : > { %900 = vmatprep.subr.bf16.mxu1 %v1217_v0 }
  0x86   : > { %878 = vmatpush3.bf16.msra.mxu0 %v877_v33 }
  0x87   : > { %879 = vmatprep.subr.bf16.mxu0 %v1217_v0 }
  0x88   : > { %902 = vmatpush3.bf16.msra.mxu1 %v901_v44 }
  0x89   : > { %903 = vmatprep.subr.bf16.mxu1 %v1217_v0 }
  0x8a   : > { %881 = vmatpush3.bf16.msra.mxu0 %v880_v37 }
  0x8b   : > { %882 = vmatprep.subr.bf16.mxu0 %v1217_v0 }
  0x8c   : > { %905 = vmatpush3.bf16.msra.mxu1 %v904_v47 }
  0x8d   : > { %906 = vmatprep.subr.bf16.mxu1 %v1217_v0 }
  0x8e   : > { %884 = vmatpush3.bf16.msra.mxu0 %v883_v40 }
  0x90   : > { %908 = vmatpush3.bf16.msra.mxu1 %v907_v50 }
  0x91   : > { %824 = vmatmul.mubr.f32.vlgmr.msra.gmra.mrb[0].mxu0 %v356_v41 }
 0x164   : > { %v446_v52 = vpop.f32.mrb[0].mxu0 }
 0x165   : > { %v447_v53 = vadd.f32 %v749_v51, %v446_v52  ;;  %v825_v54 = vpop.f32.mrb[1].mxu0 }
 0x167   : > { %1002 = vtanh.f32 %v447_v53 }
 0x171   : > { %v1003_v55 = vpop.eup %1002 }
 0x172   : > { %859 = vmatmul.mubr.f32.vlgmr.msra.gmra.mrb[0].mxu1 %v1003_v55  ;;  %451 = vst [vmem:[%s339_s9] sm:$0xff] %v1003_v55 }
 0x173   : > { %1105 = shalt.err (!%p1102_p11)
}
 0x174   : > { %s1106_s29 = scalar_lea.hbm %s1485_s15, 128  ;;  %s1110_s11 = scalar_lea.hbm %s1568_s5, 256 }
 0x175   : > { %p1107_p0 = scmp.ne.s32.totalorder %s1485_s15, %s1106_s29  ;;  %p1111_p6 = scmp.lt.u32.totalorder %s1485_s15, %s1568_s5 }
 0x176   : > { %p1112_p7 = scmp.lt.u32.totalorder %s1110_s11, %s1106_s29  ;;  %p1114_p8 = scmp.lt.u32.totalorder %s1106_s29, %s1485_s15 }
 0x177   : > { %p1108_p4 = pnand %p1107_p0, %p1586_p12 }
 0x178   : > { %p1113_p2 = por %p1112_p7, %p1111_p6 }
 0x179   : > { %p1109_p13 = pneg %p1108_p4 }
 0x17a   : > { %p1115_p1 = por %p1114_p8, %p1113_p2 }
 0x17c   : > { %p1116_p10 = pnand %p1115_p1, %p1109_p13 }
 0x17e   : > { %1119 = shalt.err (!%p1116_p10)
}
 0x17f   : > { %919 = dma.vmem_to_hbm [thread:$0]  (%p1586_p12), %s576_s19, 128, %s1485_s15, %s556_s30   ;;  %v750_v56 = vld [vmem:[%s1567_s4] ss:$0 sm:$0xff] }
 0x180   : > { %s346_s27 = scalar_lea.vmem [#allocation10], %s1445_s10  ;;  %s1514_s11 = scalar_lea.hbm %s1569_s6, %s753_s28 }
 0x181   : > { %s588_s29 = sshll.u32 %s346_s27, 4  ;;  %s561_s15 = scalar_lea.sflag [#allocation11], %s1442_s17  ;;  %s1516_s29 = int_to_ptr.vmem [resolvable:$true] %s588_s29 }
 0x182   : > { %s1120_s19 = scalar_lea.vmem %s1516_s29, 128  ;;  %s1221_s10 = smov [#allocation10]  }
 0x183   : > { %p1121_p3 = scmp.ne.s32.totalorder %s1516_s29, %s1120_s19  ;;  %s1124_s24 = sshll.u32 %s1221_s10, 4  ;;  %s1125_s24 = int_to_ptr.vmem [resolvable:$false] %s1124_s24 }
 0x184   : > { %s1126_s30 = scalar_lea.vmem %s1125_s24, 256  ;;  %p1127_p11 = scmp.lt.s32.totalorder %s1516_s29, %s1125_s24 }
 0x185   : > { %p1122_p5 = pnand %p1121_p3, %p1586_p12  ;;  %p1128_p0 = scmp.lt.s32.totalorder %s1126_s30, %s1120_s19 }
 0x187   : > { %p1123_p9 = pneg %p1122_p5  ;;  %p1129_p4 = por %p1128_p0, %p1127_p11 }
 0x189   : > { %p1130_p13 = pnand %p1129_p4, %p1123_p9 }
 0x245   : > { %v535_v57 = vpop.f32.mrb[0].mxu1 }
 0x246   : > { %v552_v58 = vadd.f32 %v750_v56, %v535_v57  ;;  %v860_v59 = vpop.f32.mrb[1].mxu1 }
 0x248   : > { %1004 = vtanh.f32 %v552_v58 }
 0x252   : > { %v1005_v60 = vpop.eup %1004 }
 0x253   : > { %554 = vst [vmem:[%s346_s27] sm:$0xff] %v1005_v60 }
 0x254   : > { %1133 = shalt.err (!%p1130_p13)
}
 0x255   : > { %s1134_s17 = scalar_lea.hbm %s1514_s11, 128  ;;  %s1138_s14 = scalar_lea.hbm %s1569_s6, 256 }
 0x256   : > { %p1135_p6 = scmp.ne.s32.totalorder %s1514_s11, %s1134_s17  ;;  %p1139_p8 = scmp.lt.u32.totalorder %s1514_s11, %s1569_s6 }
 0x257   : > { %p1140_p1 = scmp.lt.u32.totalorder %s1138_s14, %s1134_s17  ;;  %p1142_p3 = scmp.lt.u32.totalorder %s1134_s17, %s1514_s11 }
 0x258   : > { %p1136_p7 = pnand %p1135_p6, %p1586_p12 }
 0x259   : > { %p1141_p10 = por %p1140_p1, %p1139_p8 }
 0x25a   : > { %p1137_p2 = pneg %p1136_p7 }
 0x25b   : > { %p1143_p5 = por %p1142_p3, %p1141_p10 }
 0x25d   : > { %p1144_p9 = pnand %p1143_p5, %p1137_p2 }
 0x25f   : > { %1147 = shalt.err (!%p1144_p9)
}
 0x260   : > { %920 = dma.vmem_to_hbm [thread:$0]  (%p1586_p12), %s1516_s29, 128, %s1514_s11, %s561_s15  }
 0x261 PF: > { %s1587_s27 = sld [smem:[#allocation16_spill]]  ;;  %s600_s7 = sand.u32 1, %s1190_s21  }
 0x262   : > { %p1589_p0 = scmp.ge.s32.totalorder %s1210_s26, 2  ;;  %s601_s9 = scalar_lea.sflag [#allocation5], %s600_s7 }
 0x267   : > { %p1588_p11 = scmp.ne.s32.totalorder %s1587_s27, 0 }
 0x269   : > { %p935_p4 = pnand %p1589_p0, %p1588_p11 }
 0x26b   : > { %1181 = dma.done.wait (!%p935_p4), %s601_s9, 128  }
 0x26c   : > { %1183 = vsyncadd (!%p935_p4), %s601_s9, 4294967168  ;;  %s610_s19 = scalar_lea.sflag [#allocation11], %s600_s7 }
 0x26d   : > { %1185 = dma.done.wait (!%p935_p4), %s610_s19, 128  }
 0x26e   : > { %1187 = vsyncadd (!%p935_p4), %s610_s19, 4294967168  ;;  %s27_s26 = sadd.s32 1, %s1210_s26   ;;  %s1590_s21 = smov %s1194_s22 }
 0x26f   : > { %p24_p13 = scmp.ge.s32.totalorder %s27_s26, 4   ;;  %s1591_s22 = smov %s1198_s23 }
 0x270   : > { %s1592_s23 = smov %s1399_s13  ;;  %s1593_s24 = smov %s1206_s25 }
 0x271   : > { %s1594_s25 = smov %s1596_s16  ;;  %26 = sbr.rel (!%p24_p13) target bundleno = 9 (0x9), region = 123 }
 0x278   :  { %615 = vsyncpa [#allocation4], 1 }
 0x279   :  { %617 = vsyncpa [#allocation4 + $0x1], 1 }
 0x27a   :  { %618 = vsyncpa [#allocation7], 1 }
 0x27b   :  { %619 = vsyncpa [#allocation5], 1 }
 0x27c   :  { %621 = vsyncpa [#allocation5 + $0x1], 1 }
 0x27d   :  { %622 = vsyncpa [#allocation11], 1 }
 0x27e   :  { %624 = vsyncpa [#allocation11 + $0x1], 1 }

// kernel: tpu_custom_call.1
= control target key start
LH: loop header
LB: loop body
LE: loop exit
PB: predicated region body
PF: predicated region fallthrough
CT: control target
= control target key end

     0   :  { %12 = vsyncpa [#allocation4], 0  ;;  %s1563_s0 = inlined_call_operand.hbm [shape: f32[16,128], index: 0, kind: input, shape index: {}]   ;;  %s1564_s1 = inlined_call_operand.hbm [shape: f32[128,128], index: 1, kind: input, shape index: {}]   ;;  %s1565_s2 = inlined_call_operand.vmem [shape: f32[1,128], index: 2, kind: input, shape index: {}]   ;;  %s1566_s3 = inlined_call_operand.hbm [shape: f32[128,128], index: 3, kind: input, shape index: {}]   ;;  %s1567_s4 = inlined_call_operand.vmem [shape: f32[1,128], index: 4, kind: input, shape index: {}]   ;;  %s1568_s5 = inlined_call_operand.hbm [shape: f32[16,128], index: 5, kind: output, shape index: {0}]   ;;  %s1569_s6 = inlined_call_operand.hbm [shape: f32[16,128], index: 6, kind: output, shape index: {1}]  }
   0x1   :  { %14 = vsyncpa [#allocation4 + $0x1], 0 }
   0x2   :  { %15 = vsyncpa [#allocation7], 0 }
   0x3   :  { %16 = vsyncpa [#allocation5], 0 }
   0x4   :  { %18 = vsyncpa [#allocation5 + $0x1], 0 }
   0x5   :  { %19 = vsyncpa [#allocation11], 0 }
   0x6   :  { %21 = vsyncpa [#allocation11 + $0x1], 0  ;;  %s1257_s21 = smov 0   ;;  %s1259_s22 = smov 0  }
   0x7   :  { %s1261_s23 = smov 0   ;;  %s1263_s24 = smov 0  }
   0x8   :  { %s1265_s25 = smov 0   ;;  %s1267_s26 = smov 0  }
   0x9 LB: > { %s734_s27 = sadd.s32 4294967295, %s1210_s26   ;;  %s735_s28 = sadd.s32 4294967294, %s1210_s26   ;;  %s1210_s26 = sphi %s1267_s26, %s27_s26   ;;  %s1206_s25 = sphi %s1265_s25, %s1594_s25   ;;  %s1202_s24 = sphi %s1263_s24, %s1593_s24   ;;  %s1198_s23 = sphi %s1261_s23, %s1592_s23   ;;  %s1194_s22 = sphi %s1259_s22, %s1591_s22   ;;  %s1190_s21 = sphi %s1257_s21, %s1590_s21  }
   0xa   : > { %p59_p0 = scmp.ne.s32.totalorder %s1194_s22, %s1190_s21  ;;  %p1291_p1 = scmp.eq.s32.totalorder %s734_s27, 0 }
   0xb   : > { %p1295_p2 = scmp.eq.s32.totalorder %s734_s27, 1  ;;  %p190_p3 = scmp.eq.s32.totalorder %s735_s28, 1 }
   0xc   : > { %s1575_s29 = scalar_select %p1291_p1, 1, 0 }
   0xd   : > { %p1301_p4 = por %p1291_p1, %p59_p0  ;;  %p736_p5 = scmp.ge.s32.totalorder %s1210_s26, 1 }
   0xe   : > { %p1306_p6 = por %p190_p3, %p59_p0  ;;  %p223_p7 = scmp.lt.s32.totalorder %s1210_s26, 3 }
   0xf   : > { %s1577_s7 = scalar_select %p1301_p4, 1, 0 }
  0x10   : > { %s1578_s8 = scalar_select %p1306_p6, 1, 0 }
  0x11   : > { %p1311_p8 = pnand %p736_p5, %p223_p7  ;;  %s1212_s10 = smov [#allocation6]  }
  0x12   : > { %1579 = sst [smem:[#allocation16_spill]] %s1578_s8  ;;  %s237_s11 = sshll.u32 %s1212_s10, 4  ;;  %s1315_s11 = int_to_ptr.vmem [resolvable:$true] %s237_s11 }
  0x13   : > { %p923_p9 = pneg %p1311_p8  ;;  %s1213_s13 = smov [#allocation8]  }
  0x14   : > { %s259_s14 = sshll.u32 %s1213_s13, 4  ;;  %s1006_s17 = scalar_lea.hbm %s1564_s1, 2048  ;;  %s1326_s14 = int_to_ptr.vmem [resolvable:$true] %s259_s14 }
  0x15   : > { %p1322_p11 = pnand %p923_p9, %p1291_p1  ;;  %p1007_p12 = scmp.ne.s32.totalorder %s1564_s1, %s1006_s17 }
  0x16   : > { %p1013_p5 = scmp.lt.u32.totalorder %s1006_s17, %s1564_s1 }
  0x17   : > { %p1008_p13 = pneg %p1322_p11 }
  0x19   : > { %p1009_p0 = pnand %p1008_p13, %p1007_p12 }
  0x1b   : > { %p1010_p3 = pneg %p1009_p0 }
  0x1d   : > { %p1015_p7 = pnand %p1013_p5, %p1010_p3 }
  0x1f   : > { %1018 = shalt.err (!%p1015_p7)
}
  0x20   : > { %s1019_s28 = scalar_lea.vmem %s1315_s11, 2048  ;;  %p1027_p1 = scmp.lt.s32.totalorder %s1315_s11, %s1315_s11 }
  0x21   : > { %p1020_p9 = scmp.ne.s32.totalorder %s1315_s11, %s1019_s28  ;;  %p1028_p12 = scmp.lt.s32.totalorder %s1019_s28, %s1019_s28 }
  0x23   : > { %p1022_p10 = pnand %p1020_p9, %p1008_p13  ;;  %p1029_p0 = por %p1028_p12, %p1027_p1 }
  0x25   : > { %p1023_p6 = pneg %p1022_p10 }
  0x27   : > { %p1030_p4 = pnand %p1029_p0, %p1023_p6 }
  0x29   : > { %1033 = shalt.err (!%p1030_p4)
}
  0x2a   : > { %s1214_s10 = smov 128   ;;  %s1215_s13 = smov 8  }
  0x2b   : > { %926 = dma.hbm_to_vmem [thread:$0]  (!%p1322_p11), %s1564_s1, 2048, %s1315_s11, [#allocation7], %s1214_s10, %s1214_s10, %s1215_s13  }
  0x2c   : > { %s1034_s19 = scalar_lea.hbm %s1566_s3, 2048 }
  0x2d   : > { %p1035_p1 = scmp.ne.s32.totalorder %s1566_s3, %s1034_s19  ;;  %p1041_p10 = scmp.lt.u32.totalorder %s1034_s19, %s1566_s3 }
  0x2f   : > { %p1037_p4 = pnand %p1035_p1, %p1008_p13 }
  0x31   : > { %p1038_p6 = pneg %p1037_p4 }
  0x33   : > { %p1043_p3 = pnand %p1041_p10, %p1038_p6 }
  0x35   : > { %1046 = shalt.err (!%p1043_p3)
}
  0x36   : > { %s1047_s11 = scalar_lea.vmem %s1326_s14, 2048  ;;  %p1055_p12 = scmp.lt.s32.totalorder %s1326_s14, %s1326_s14 }
  0x37   : > { %p1048_p5 = scmp.ne.s32.totalorder %s1326_s14, %s1047_s11  ;;  %p1056_p0 = scmp.lt.s32.totalorder %s1047_s11, %s1047_s11 }
  0x39   : > { %p1050_p7 = pnand %p1048_p5, %p1008_p13  ;;  %p1057_p1 = por %p1056_p0, %p1055_p12 }
  0x3b   : > { %p1051_p9 = pneg %p1050_p7 }
  0x3d   : > { %p1058_p4 = pnand %p1057_p1, %p1051_p9 }
  0x3f   : > { %1061 = shalt.err (!%p1058_p4)
}
  0x40   : > { %929 = dma.hbm_to_vmem [thread:$0]  (!%p1322_p11), %s1566_s3, 2048, %s1326_s14, [#allocation7], %s1214_s10, %s1214_s10, %s1215_s13  }
  0x41   : > { %s39_s16 = sadd.s32 1, %s1206_s25  ;;  %s46_s17 = sadd.s32 1, %s1198_s23 }
  0x42   : > { %p41_p13 = scmp.ge.s32.totalorder %s39_s16, 2  ;;  %p53_p6 = scmp.ne.s32.totalorder %s1198_s23, %s1194_s22 }
  0x43   : > { %p54_p10 = scmp.eq.s32.totalorder %s1210_s26, 0  ;;  %p943_p3 = scmp.lt.s32.totalorder %s1210_s26, 2 }
  0x44   : > { %s1596_s16 = smov (%p41_p13, %s39_s16), 0  ;;  %p1390_p7 = por %p1295_p2, %p53_p6 }
  0x45   : > { %p55_p5 = por %p54_p10, %p53_p6  ;;  %s43_s18 = ssub.s32 %s1206_s25, %s1596_s16 }
  0x46   : > { %s1582_s12 = scalar_select %p1390_p7, 1, 0 }
  0x47   : > { %s276_s19 = sand.u32 1, %s1198_s23   ;;  %p44_p9 = scmp.eq.s32.totalorder %s43_s18, 0 }
  0x48   : > { %s741_s14 = sshll.u32 %s276_s19, 3  ;;  %s742_s10 = sshll.u32 %s1206_s25, 7 }
  0x49   : > { %s1399_s13 = scalar_select %p44_p9, %s1198_s23, %s46_s17  }
  0x4a   : > { %s1404_s28 = scalar_lea.hbm %s1563_s0, %s742_s10  ;;  %s280_s30 = scalar_lea.vmem [#allocation3], %s741_s14 }
  0x4b   : > { %s287_s11 = sshll.u32 %s280_s30, 4  ;;  %p1408_p2 = pnand %p943_p3, %p55_p5  ;;  %s1412_s11 = int_to_ptr.vmem [resolvable:$true] %s287_s11 }
  0x4c   : > { %s277_s15 = scalar_lea.sflag [#allocation4], %s276_s19  ;;  %s1062_s17 = scalar_lea.hbm %s1404_s28, 128 }
  0x4d   : > { %p1063_p11 = scmp.ne.s32.totalorder %s1404_s28, %s1062_s17  ;;  %p1064_p12 = pneg %p1408_p2 }
  0x4e   : > { %s1067_s10 = scalar_lea.hbm %s1563_s0, 256  ;;  %p1068_p4 = scmp.lt.u32.totalorder %s1404_s28, %s1563_s0 }
  0x4f   : > { %p1065_p0 = pnand %p1064_p12, %p1063_p11  ;;  %p1069_p13 = scmp.lt.u32.totalorder %s1067_s10, %s1062_s17 }
  0x50   : > { %p1071_p10 = scmp.lt.u32.totalorder %s1062_s17, %s1404_s28 }
  0x51   : > { %p1066_p1 = pneg %p1065_p0  ;;  %p1070_p6 = por %p1069_p13, %p1068_p4 }
  0x53   : > { %p1072_p3 = por %p1071_p10, %p1070_p6 }
  0x55   : > { %p1073_p5 = pnand %p1072_p3, %p1066_p1 }
  0x57   : > { %1076 = shalt.err (!%p1073_p5)
}
  0x58   : > { %s1077_s19 = scalar_lea.vmem %s1412_s11, 128  ;;  %s1216_s30 = smov [#allocation3]  }
  0x59   : > { %p1078_p9 = scmp.ne.s32.totalorder %s1412_s11, %s1077_s19  ;;  %s1082_s18 = sshll.u32 %s1216_s30, 4  ;;  %s1083_s18 = int_to_ptr.vmem [resolvable:$false] %s1082_s18 }
  0x5a   : > { %s1084_s14 = scalar_lea.vmem %s1083_s18, 256  ;;  %p1085_p7 = scmp.lt.s32.totalorder %s1412_s11, %s1083_s18 }
  0x5b   : > { %p1080_p11 = pnand %p1078_p9, %p1064_p12  ;;  %p1086_p4 = scmp.lt.s32.totalorder %s1084_s14, %s1077_s19 }
  0x5d   : > { %p1081_p0 = pneg %p1080_p11  ;;  %p1087_p13 = por %p1086_p4, %p1085_p7 }
  0x5f   : > { %p1088_p6 = pnand %p1087_p13, %p1081_p0 }
  0x61   : > { %1091 = shalt.err (!%p1088_p6)
}
  0x62   : > { %933 = dma.hbm_to_vmem [thread:$0]  (!%p1408_p2), %s1404_s28, 128, %s1412_s11, %s277_s15  }
  0x63   : > { %296 = sbr.rel (%p1311_p8) target bundleno = 609 (0x261), region = 40  ;;  %s1442_s17 = sand.u32 (!%p1311_p8), 1, %s1194_s22  }
  0x64   : > { %s1445_s10 = sshll.u32 (!%p1311_p8), %s1442_s17, 3  ;;  %s299_s20 = scalar_lea.sflag (!%p1311_p8), [#allocation4], %s1442_s17 }
  0x65   : > { %s302_s27 = scalar_lea.vmem (!%p1311_p8), [#allocation3], %s1445_s10  ;;  %p1584_p7 = scmp.ne.s32.totalorder (!%p1311_p8), %s1577_s7, 0 }
  0x6a   : > { %1173 = dma.done.wait (%p1584_p7), %s299_s20, 128  }
  0x6b   : > { %1175 = vsyncadd (%p1584_p7), %s299_s20, 4294967168  ;;  %p1585_p2 = scmp.ne.s32.totalorder %s1575_s29, 0 }
  0x6d   : > { %1177 = dma.done.wait (%p1585_p2), [#allocation7], 4096  }
  0x6e   : > { %1179 = vsyncadd (%p1585_p2), [#allocation7], 4294963200  ;;  %v1217_v0 = vmov 0.0|0.0   ;;  %vm1218_vm0 = vmmov 0   ;;  %v1219_v1 = vmov 0.0   ;;  %v357_v2 = vld [vmem:[#allocation6] sm:$0xff] }
  0x6f   : > { %861 = vmatprep.subr.bf16.mxu0 %v1217_v0  ;;  %823 = vmatprep.mubr.msk.f32.mxu0 %vm1218_vm0, %v1219_v1  ;;  %v358_v3 = vld [vmem:[#allocation6 + $0x8] sm:$0xff]  ;;  %v359_v4 = vld [vmem:[#allocation6 + $0x10] sm:$0xff]  ;;  %v360_v6 = vld [vmem:[#allocation6 + $0x18] sm:$0xff]  ;;  %s339_s9 = scalar_lea.vmem [#allocation9], %s1445_s10  ;;  %s753_s28 = sshll.u32 %s1202_s24, 7 }
  0x70   : > { %885 = vmatprep.subr.bf16.mxu1 %v1217_v0  ;;  %858 = vmatprep.mubr.msk.f32.mxu1 %vm1218_vm0, %v1219_v1  ;;  %v862_v5 = vpack.c.bf16 %v358_v3, %v357_v2  ;;  %v865_v7 = vpack.c.bf16 %v360_v6, %v359_v4  ;;  %v361_v8 = vld [vmem:[#allocation6 + $0x20] sm:$0xff]  ;;  %v362_v9 = vld [vmem:[#allocation6 + $0x28] sm:$0xff]  ;;  %v455_v12 = vld [vmem:[#allocation8 + $0x10] sm:$0xff]  ;;  %s1485_s15 = scalar_lea.hbm %s1568_s5, %s753_s28  ;;  %s575_s19 = sshll.u32 %s339_s9, 4  ;;  %s576_s19 = int_to_ptr.vmem [resolvable:$true] %s575_s19 }
  0x71   : > { %v453_v10 = vld [vmem:[#allocation8] sm:$0xff]  ;;  %v454_v11 = vld [vmem:[#allocation8 + $0x8] sm:$0xff]  ;;  %v456_v13 = vld [vmem:[#allocation8 + $0x18] sm:$0xff]  ;;  %v868_v14 = vpack.c.bf16 %v362_v9, %v361_v8  ;;  %s556_s30 = scalar_lea.sflag [#allocation5], %s1442_s17  ;;  %s1092_s18 = scalar_lea.vmem %s576_s19, 128 }
  0x72   : > { %863 = vmatpush3.bf16.msra.mxu0 %v862_v5  ;;  %v886_v15 = vpack.c.bf16 %v454_v11, %v453_v10  ;;  %v363_v16 = vld [vmem:[#allocation6 + $0x30] sm:$0xff]  ;;  %v364_v17 = vld [vmem:[#allocation6 + $0x38] sm:$0xff]  ;;  %v889_v18 = vpack.c.bf16 %v456_v13, %v455_v12  ;;  %v457_v19 = vld [vmem:[#allocation8 + $0x20] sm:$0xff]  ;;  %p1093_p8 = scmp.ne.s32.totalorder %s576_s19, %s1092_s18  ;;  %p1586_p12 = scmp.ne.s32.totalorder %s1582_s12, 0 }
  0x73   : > { %864 = vmatprep.subr.bf16.mxu0 %v1217_v0  ;;  %v458_v20 = vld [vmem:[#allocation8 + $0x28] sm:$0xff]  ;;  %v871_v21 = vpack.c.bf16 %v364_v17, %v363_v16  ;;  %v365_v22 = vld [vmem:[#allocation6 + $0x40] sm:$0xff]  ;;  %v459_v25 = vld [vmem:[#allocation8 + $0x30] sm:$0xff]  ;;  %s1220_s14 = smov [#allocation9]  }
  0x74   : > { %887 = vmatpush3.bf16.msra.mxu1 %v886_v15  ;;  %v366_v23 = vld [vmem:[#allocation6 + $0x48] sm:$0xff]  ;;  %v892_v24 = vpack.c.bf16 %v458_v20, %v457_v19  ;;  %v460_v26 = vld [vmem:[#allocation8 + $0x38] sm:$0xff]  ;;  %v367_v28 = vld [vmem:[#allocation6 + $0x50] sm:$0xff]  ;;  %p1094_p1 = pnand %p1093_p8, %p1586_p12  ;;  %s1096_s20 = sshll.u32 %s1220_s14, 4  ;;  %s1097_s20 = int_to_ptr.vmem [resolvable:$false] %s1096_s20 }
  0x75   : > { %888 = vmatprep.subr.bf16.mxu1 %v1217_v0  ;;  %v874_v27 = vpack.c.bf16 %v366_v23, %v365_v22  ;;  %v368_v29 = vld [vmem:[#allocation6 + $0x58] sm:$0xff]  ;;  %v895_v30 = vpack.c.bf16 %v460_v26, %v459_v25  ;;  %v461_v31 = vld [vmem:[#allocation8 + $0x40] sm:$0xff]  ;;  %v462_v32 = vld [vmem:[#allocation8 + $0x48] sm:$0xff]  ;;  %p1099_p3 = scmp.lt.s32.totalorder %s576_s19, %s1097_s20 }
  0x76   : > { %866 = vmatpush3.bf16.msra.mxu0 %v865_v7  ;;  %v877_v33 = vpack.c.bf16 %v368_v29, %v367_v28  ;;  %v369_v34 = vld [vmem:[#allocation6 + $0x60] sm:$0xff]  ;;  %v370_v35 = vld [vmem:[#allocation6 + $0x68] sm:$0xff]  ;;  %v898_v36 = vpack.c.bf16 %v462_v32, %v461_v31  ;;  %v371_v38 = vld [vmem:[#allocation6 + $0x70] sm:$0xff]  ;;  %p1095_p10 = pneg %p1094_p1 }
  0x77   : > { %867 = vmatprep.subr.bf16.mxu0 %v1217_v0  ;;  %v880_v37 = vpack.c.bf16 %v370_v35, %v369_v34  ;;  %v372_v39 = vld [vmem:[#allocation6 + $0x78] sm:$0xff]  ;;  %v463_v42 = vld [vmem:[#allocation8 + $0x50] sm:$0xff]  ;;  %v465_v45 = vld [vmem:[#allocation8 + $0x60] sm:$0xff] }
  0x78   : > { %890 = vmatpush3.bf16.msra.mxu1 %v889_v18  ;;  %v883_v40 = vpack.c.bf16 %v372_v39, %v371_v38  ;;  %v356_v41 = vld [vmem:[%s302_s27] sm:$0xff]  ;;  %v466_v46 = vld [vmem:[#allocation8 + $0x68] sm:$0xff]  ;;  %s1098_s27 = scalar_lea.vmem %s1097_s20, 256 }
  0x79   : > { %891 = vmatprep.subr.bf16.mxu1 %v1217_v0  ;;  %v464_v43 = vld [vmem:[#allocation8 + $0x58] sm:$0xff]  ;;  %v904_v47 = vpack.c.bf16 %v466_v46, %v465_v45  ;;  %v467_v48 = vld [vmem:[#allocation8 + $0x70] sm:$0xff]  ;;  %p1100_p5 = scmp.lt.s32.totalorder %s1098_s27, %s1092_s18 }
  0x7a   : > { %869 = vmatpush3.bf16.msra.mxu0 %v868_v14  ;;  %v901_v44 = vpack.c.bf16 %v464_v43, %v463_v42  ;;  %v468_v49 = vld [vmem:[#allocation8 + $0x78] sm:$0xff]  ;;  %v749_v51 = vld [vmem:[%s1565_s2] ss:$0 sm:$0xff] }
  0x7b   : > { %870 = vmatprep.subr.bf16.mxu0 %v1217_v0  ;;  %v907_v50 = vpack.c.bf16 %v468_v49, %v467_v48  ;;  %p1101_p9 = por %p1100_p5, %p1099_p3 }
  0x7c   : > { %893 = vmatpush3.bf16.msra.mxu1 %v892_v24 }
  0x7d   : > { %894 = vmatprep.subr.bf16.mxu1 %v1217_v0  ;;  %p1102_p11 = pnand %p1101_p9, %p1095_p10 }
  0x7e   : > { %872 = vmatpush3.bf16.msra.mxu0 %v871_v21 }
  0x7f   : > { %873 = vmatprep.subr.bf16.mxu0 %v1217_v0 }
  0x80   : > { %896 = vmatpush3.bf16.msra.mxu1 %v895_v30 }
  0x81   : > { %897 = vmatprep.subr.bf16.mxu1 %v1217_v0 }
  0x82   : > { %875 = vmatpush3.bf16.msra.mxu0 %v874_v27 }
  0x83   : > { %876 = vmatprep.subr.bf16.mxu0 %v1217_v0 }
  0x84   : > { %899 = vmatpush3.bf16.msra.mxu1 %v898_v36 }
  0x85   : > { %900 = vmatprep.subr.bf16.mxu1 %v1217_v0 }
  0x86   : > { %878 = vmatpush3.bf16.msra.mxu0 %v877_v33 }
  0x87   : > { %879 = vmatprep.subr.bf16.mxu0 %v1217_v0 }
  0x88   : > { %902 = vmatpush3.bf16.msra.mxu1 %v901_v44 }
  0x89   : > { %903 = vmatprep.subr.bf16.mxu1 %v1217_v0 }
  0x8a   : > { %881 = vmatpush3.bf16.msra.mxu0 %v880_v37 }
  0x8b   : > { %882 = vmatprep.subr.bf16.mxu0 %v1217_v0 }
  0x8c   : > { %905 = vmatpush3.bf16.msra.mxu1 %v904_v47 }
  0x8d   : > { %906 = vmatprep.subr.bf16.mxu1 %v1217_v0 }
  0x8e   : > { %884 = vmatpush3.bf16.msra.mxu0 %v883_v40 }
  0x90   : > { %908 = vmatpush3.bf16.msra.mxu1 %v907_v50 }
  0x91   : > { %824 = vmatmul.mubr.f32.vlgmr.msra.gmra.mrb[0].mxu0 %v356_v41 }
 0x164   : > { %v446_v52 = vpop.f32.mrb[0].mxu0 }
 0x165   : > { %v447_v53 = vadd.f32 %v749_v51, %v446_v52  ;;  %v825_v54 = vpop.f32.mrb[1].mxu0 }
 0x167   : > { %1002 = vtanh.f32 %v447_v53 }
 0x171   : > { %v1003_v55 = vpop.eup %1002 }
 0x172   : > { %859 = vmatmul.mubr.f32.vlgmr.msra.gmra.mrb[0].mxu1 %v1003_v55  ;;  %451 = vst [vmem:[%s339_s9] sm:$0xff] %v1003_v55 }
 0x173   : > { %1105 = shalt.err (!%p1102_p11)
}
 0x174   : > { %s1106_s29 = scalar_lea.hbm %s1485_s15, 128  ;;  %s1110_s11 = scalar_lea.hbm %s1568_s5, 256 }
 0x175   : > { %p1107_p0 = scmp.ne.s32.totalorder %s1485_s15, %s1106_s29  ;;  %p1111_p6 = scmp.lt.u32.totalorder %s1485_s15, %s1568_s5 }
 0x176   : > { %p1112_p7 = scmp.lt.u32.totalorder %s1110_s11, %s1106_s29  ;;  %p1114_p8 = scmp.lt.u32.totalorder %s1106_s29, %s1485_s15 }
 0x177   : > { %p1108_p4 = pnand %p1107_p0, %p1586_p12 }
 0x178   : > { %p1113_p2 = por %p1112_p7, %p1111_p6 }
 0x179   : > { %p1109_p13 = pneg %p1108_p4 }
 0x17a   : > { %p1115_p1 = por %p1114_p8, %p1113_p2 }
 0x17c   : > { %p1116_p10 = pnand %p1115_p1, %p1109_p13 }
 0x17e   : > { %1119 = shalt.err (!%p1116_p10)
}
 0x17f   : > { %919 = dma.vmem_to_hbm [thread:$0]  (%p1586_p12), %s576_s19, 128, %s1485_s15, %s556_s30   ;;  %v750_v56 = vld [vmem:[%s1567_s4] ss:$0 sm:$0xff] }
 0x180   : > { %s346_s27 = scalar_lea.vmem [#allocation10], %s1445_s10  ;;  %s1514_s11 = scalar_lea.hbm %s1569_s6, %s753_s28 }
 0x181   : > { %s588_s29 = sshll.u32 %s346_s27, 4  ;;  %s561_s15 = scalar_lea.sflag [#allocation11], %s1442_s17  ;;  %s1516_s29 = int_to_ptr.vmem [resolvable:$true] %s588_s29 }
 0x182   : > { %s1120_s19 = scalar_lea.vmem %s1516_s29, 128  ;;  %s1221_s10 = smov [#allocation10]  }
 0x183   : > { %p1121_p3 = scmp.ne.s32.totalorder %s1516_s29, %s1120_s19  ;;  %s1124_s24 = sshll.u32 %s1221_s10, 4  ;;  %s1125_s24 = int_to_ptr.vmem [resolvable:$false] %s1124_s24 }
 0x184   : > { %s1126_s30 = scalar_lea.vmem %s1125_s24, 256  ;;  %p1127_p11 = scmp.lt.s32.totalorder %s1516_s29, %s1125_s24 }
 0x185   : > { %p1122_p5 = pnand %p1121_p3, %p1586_p12  ;;  %p1128_p0 = scmp.lt.s32.totalorder %s1126_s30, %s1120_s19 }
 0x187   : > { %p1123_p9 = pneg %p1122_p5  ;;  %p1129_p4 = por %p1128_p0, %p1127_p11 }
 0x189   : > { %p1130_p13 = pnand %p1129_p4, %p1123_p9 }
 0x245   : > { %v535_v57 = vpop.f32.mrb[0].mxu1 }
 0x246   : > { %v552_v58 = vadd.f32 %v750_v56, %v535_v57  ;;  %v860_v59 = vpop.f32.mrb[1].mxu1 }
 0x248   : > { %1004 = vtanh.f32 %v552_v58 }
 0x252   : > { %v1005_v60 = vpop.eup %1004 }
 0x253   : > { %554 = vst [vmem:[%s346_s27] sm:$0xff] %v1005_v60 }
 0x254   : > { %1133 = shalt.err (!%p1130_p13)
}
 0x255   : > { %s1134_s17 = scalar_lea.hbm %s1514_s11, 128  ;;  %s1138_s14 = scalar_lea.hbm %s1569_s6, 256 }
 0x256   : > { %p1135_p6 = scmp.ne.s32.totalorder %s1514_s11, %s1134_s17  ;;  %p1139_p8 = scmp.lt.u32.totalorder %s1514_s11, %s1569_s6 }
 0x257   : > { %p1140_p1 = scmp.lt.u32.totalorder %s1138_s14, %s1134_s17  ;;  %p1142_p3 = scmp.lt.u32.totalorder %s1134_s17, %s1514_s11 }
 0x258   : > { %p1136_p7 = pnand %p1135_p6, %p1586_p12 }
 0x259   : > { %p1141_p10 = por %p1140_p1, %p1139_p8 }
 0x25a   : > { %p1137_p2 = pneg %p1136_p7 }
 0x25b   : > { %p1143_p5 = por %p1142_p3, %p1141_p10 }
 0x25d   : > { %p1144_p9 = pnand %p1143_p5, %p1137_p2 }
 0x25f   : > { %1147 = shalt.err (!%p1144_p9)
}
 0x260   : > { %920 = dma.vmem_to_hbm [thread:$0]  (%p1586_p12), %s1516_s29, 128, %s1514_s11, %s561_s15  }
 0x261 PF: > { %s1587_s27 = sld [smem:[#allocation16_spill]]  ;;  %s600_s7 = sand.u32 1, %s1190_s21  }
 0x262   : > { %p1589_p0 = scmp.ge.s32.totalorder %s1210_s26, 2  ;;  %s601_s9 = scalar_lea.sflag [#allocation5], %s600_s7 }
 0x267   : > { %p1588_p11 = scmp.ne.s32.totalorder %s1587_s27, 0 }
 0x269   : > { %p935_p4 = pnand %p1589_p0, %p1588_p11 }
 0x26b   : > { %1181 = dma.done.wait (!%p935_p4), %s601_s9, 128  }
 0x26c   : > { %1183 = vsyncadd (!%p935_p4), %s601_s9, 4294967168  ;;  %s610_s19 = scalar_lea.sflag [#allocation11], %s600_s7 }
 0x26d   : > { %1185 = dma.done.wait (!%p935_p4), %s610_s19, 128  }
 0x26e   : > { %1187 = vsyncadd (!%p935_p4), %s610_s19, 4294967168  ;;  %s27_s26 = sadd.s32 1, %s1210_s26   ;;  %s1590_s21 = smov %s1194_s22 }
 0x26f   : > { %p24_p13 = scmp.ge.s32.totalorder %s27_s26, 4   ;;  %s1591_s22 = smov %s1198_s23 }
 0x270   : > { %s1592_s23 = smov %s1399_s13  ;;  %s1593_s24 = smov %s1206_s25 }
 0x271   : > { %s1594_s25 = smov %s1596_s16  ;;  %26 = sbr.rel (!%p24_p13) target bundleno = 9 (0x9), region = 123 }
 0x278   :  { %615 = vsyncpa [#allocation4], 1 }
 0x279   :  { %617 = vsyncpa [#allocation4 + $0x1], 1 }
 0x27a   :  { %618 = vsyncpa [#allocation7], 1 }
 0x27b   :  { %619 = vsyncpa [#allocation5], 1 }
 0x27c   :  { %621 = vsyncpa [#allocation5 + $0x1], 1 }
 0x27d   :  { %622 = vsyncpa [#allocation11], 1 }
 0x27e   :  { %624 = vsyncpa [#allocation11 + $0x1], 1 }

</bundles_post_ra>
